<compile_context>
chip_gen: v5e
topology: v5e:2x2
jax: 0.10.0
libtpu: 0.0.40
codegen_flags: <defaults>
</compile_context>

<pallas_src>
import math

import jax
import jax.numpy as jnp
from jax.experimental import pallas as pl
from jax.experimental.pallas import tpu as pltpu


# ----------------------------- glue helpers ---------------------------------

def _round_up(x, m):
    return ((x + m - 1) // m) * m


def _axis_rot(axis, angle):
    c, s = jnp.cos(angle), jnp.sin(angle)
    o, z = jnp.ones_like(angle), jnp.zeros_like(angle)
    if axis == "X":
        flat = (o, z, z, z, c, -s, z, s, c)
    elif axis == "Y":
        flat = (c, z, s, z, o, z, -s, z, c)
    else:  # "Z"
        flat = (c, -s, z, s, c, z, z, z, o)
    return jnp.stack(flat, axis=-1).reshape(angle.shape + (3, 3))


def euler_angles_to_matrix_xyz(euler):
    """pytorch3d.transforms.euler_angles_to_matrix(euler, 'XYZ'). euler: [..., 3]."""
    rx = _axis_rot("X", euler[..., 0])
    ry = _axis_rot("Y", euler[..., 1])
    rz = _axis_rot("Z", euler[..., 2])
    return rx @ ry @ rz


def pad4(m3):
    """[..., 3, 3] -> [..., 4, 4] homogeneous (zero pad, 1 at (3, 3))."""
    prefix = m3.shape[:-2]
    m4 = jnp.zeros(prefix + (4, 4), m3.dtype)
    m4 = m4.at[..., :3, :3].set(m3)
    m4 = m4.at[..., 3, 3].set(1.0)
    return m4


# --------------- Pallas kernel: rasterization post-process ------------------

_TAB_ROWS = 24                        # 9 xyz hi + 9 xyz lo + 1 label + 5 pad
_VMEM_LIMIT_BYTES = 40 * 1024 * 1024  # <= v7x 64 MiB physical, explicit headroom
_ONEHOT_BUDGET_BYTES = 12 * 1024 * 1024  # iota (4 B) + onehot (2 B) per CF*TP elem


def _pick_face_chunk(nf):
    """Face-contraction chunk: multiple of 256 (whole MXU K-tiles), <= 1024."""
    return min(1024, _round_up(nf, 256))


def _pick_pixel_tile(p128, cf):
    """Largest 128-multiple pixel tile keeping the per-chunk one-hot + iota
    intermediates under the VMEM budget (TP ~2048 at CF=1024; 8k+ at small NF)."""
    cap = (_ONEHOT_BUDGET_BYTES // (6 * cf)) // 128 * 128
    cap = max(128, min(cap, 32768))
    return min(cap, p128)


def _make_rasterize_kernel(nf, cf, num_chunks):
    """Per grid step (one batch element, TP pixels):
       p2f_ref : (1, 1, TP)  int32   packed face id (<0 = background)
       pick_ref: (1, 1, TP)  int32   argmax corner index (0/1/2), precomputed
       tab_ref : (C, 24, CF) bf16    resident fused face table, chunked:
                                     rows 0-8 xyz hi, 9-17 xyz lo, 18 label
       sem_ref : (1, 3, TP)  f32     T-pose xyz of the selected corner
       seg_ref : (1, 1, TP)  int32   body-part segment id
    """

    def kernel(p2f_ref, pick_ref, tab_ref, sem_ref, seg_ref):
        tp = p2f_ref.shape[-1]
        p2f = p2f_ref[0]                         # (1, TP) int32
        bg = p2f < 0
        f = p2f % nf                             # python-style mod == torch %

        # Hoisted, loop-invariant chunk-local iota (faces on sublanes).
        iota_c = jax.lax.broadcasted_iota(jnp.int32, (cf, tp), 0)

        def chunk_body(c, acc):
            tab_c = tab_ref[c]                   # (24, CF) bf16
            # compare -> bf16 convert; exact 0/1, no f32 select.
            onehot = (iota_c == (f - c * cf)).astype(jnp.bfloat16)   # (CF, TP)
            # MXU gather; f32 accumulation keeps hi/lo reconstruction exact.
            return acc + jnp.dot(tab_c, onehot,
                                 preferred_element_type=jnp.float32)

        acc0 = jnp.zeros((_TAB_ROWS, tp), jnp.float32)
        if num_chunks == 1:
            vals = chunk_body(0, acc0)
        else:
            vals = jax.lax.fori_loop(0, num_chunks, chunk_body, acc0)

        xyz = vals[0:9, :] + vals[9:18, :]       # bf16 hi + lo -> ~1e-5 accurate
        pick = pick_ref[0]                       # (1, TP) int32
        sem = jnp.where(pick == 0, xyz[0:3, :],
                        jnp.where(pick == 1, xyz[3:6, :], xyz[6:9, :]))
        sem_ref[0] = jnp.where(bg, 0.0, sem)     # zero background pixels

        lab = (vals[18:19, :] + 0.5).astype(jnp.int32)   # labels: exact ints >= 0
        seg_ref[0] = jnp.where(bg, 1, lab + 2)

    return kernel


def rasterize_post_pallas(pix_to_face, bary_coords, smpl_faces,
                          smpl_faces_to_labels, tpose_vertices0, height, width):
    B = pix_to_face.shape[0]
    P = height * width
    NF = int(smpl_faces.shape[0])

    CF = _pick_face_chunk(NF)
    NF_pad = _round_up(NF, CF)
    num_chunks = NF_pad // CF

    # --- tiny one-time prep in plain JAX (O(NF), not O(P)) ------------------
    # Fused per-face table: T-pose xyz of the 3 corners (bf16 hi + lo rows for
    # ~f32 accuracy through the MXU gather) + the body label (exact in bf16).
    corner_xyz = tpose_vertices0.astype(jnp.float32)[smpl_faces]      # (NF,3,3)
    xyz9 = corner_xyz.reshape(NF, 9)
    hi = xyz9.astype(jnp.bfloat16)
    lo = (xyz9 - hi.astype(jnp.float32)).astype(jnp.bfloat16)
    lab = smpl_faces_to_labels.astype(jnp.bfloat16)[:, None]
    tab = jnp.concatenate(
        [hi, lo, lab, jnp.zeros((NF, _TAB_ROWS - 19), jnp.bfloat16)], axis=1)
    tab = jnp.pad(tab, ((0, NF_pad - NF), (0, 0)))                    # (NFp,24)
    tab = jnp.transpose(tab.reshape(num_chunks, CF, _TAB_ROWS), (0, 2, 1))

    # --- lane-dense pixel streams (8 B/px: face id + corner pick) -----------
    p2f = pix_to_face.reshape(B, 1, P).astype(jnp.int32)
    pick = jnp.argmax(bary_coords.astype(jnp.float32).reshape(B, P, 3),
                      axis=-1).astype(jnp.int32).reshape(B, 1, P)

    P128 = _round_up(P, 128)
    TP = _pick_pixel_tile(P128, CF)
    P_pad = _round_up(P, TP)
    if P_pad != P:
        # padded pixels are background (p2f = -1); sliced off below.
        p2f = jnp.pad(p2f, ((0, 0), (0, 0), (0, P_pad - P)), constant_values=-1)
        pick = jnp.pad(pick, ((0, 0), (0, 0), (0, P_pad - P)))

    grid = (B, P_pad // TP)
    sem, seg = pl.pallas_call(
        _make_rasterize_kernel(NF, CF, num_chunks),
        out_shape=(jax.ShapeDtypeStruct((B, 3, P_pad), jnp.float32),
                   jax.ShapeDtypeStruct((B, 1, P_pad), jnp.int32)),
        grid=grid,
        in_specs=[
            pl.BlockSpec((1, 1, TP), lambda b, i: (b, 0, i)),
            pl.BlockSpec((1, 1, TP), lambda b, i: (b, 0, i)),
            pl.BlockSpec((num_chunks, _TAB_ROWS, CF), lambda b, i: (0, 0, 0)),
        ],
        out_specs=(
            pl.BlockSpec((1, 3, TP), lambda b, i: (b, 0, i)),
            pl.BlockSpec((1, 1, TP), lambda b, i: (b, 0, i)),
        ),
        compiler_params=pltpu.CompilerParams(
            dimension_semantics=("parallel", "parallel"),
            vmem_limit_bytes=_VMEM_LIMIT_BYTES),
    )(p2f, pick, tab)

    sem = sem[:, :, :P].reshape(B, 3, height, width)
    seg = seg[:, 0, :P].reshape(B, height, width)
    return sem, seg


# ------------------------------ module wrapper -------------------------------

class SHHQPreprocessorPallas:
    def __init__(self, gen_height, gen_width, smpl_faces, smpl_faces_to_labels,
                 coordinate_mode="fix_body"):
        # TODO(synk): 'fix_camera' (LBS re-posing) branch not implemented here.
        assert coordinate_mode == "fix_body"
        self.height = gen_height
        self.width = gen_width
        self.smpl_faces = smpl_faces.astype(jnp.int32)
        self.smpl_faces_to_labels = smpl_faces_to_labels.astype(jnp.int32)
        # Kernel's (+0.5 -> int) label rounding assumes non-negative labels.
        assert int(jnp.min(self.smpl_faces_to_labels)) >= 0

    def forward(self, data, pix_to_face, bary_coords, *, rotate=False, key=None,
                h_mean=0.0, v_mean=0.0, h_stddev=0.0, v_stddev=0.0, **kwargs):
        B = data["scales"].shape[0]
        if rotate:
            k1, k2 = jax.random.split(key)
            h = jax.random.normal(k1, (B,)) * h_stddev + h_mean
            v = jax.random.normal(k2, (B,)) * v_stddev + v_mean
        else:
            h = jnp.full((B,), h_mean, jnp.float32)
            v = jnp.full((B,), v_mean, jnp.float32)
        r = jnp.zeros_like(h)
        return self.forward_with_rotation(data, pix_to_face, bary_coords, h, v, r)

    def forward_with_rotation(self, data, pix_to_face, bary_coords,
                              h_rot, v_rot, r_rot):
        # ----------------- _forward_fix_body (plain JAX) --------------------
        # (B,4,4) pose chain is launch-overhead dominated in a kernel; XLA fuses it.
        root_rotation = data["full_pose"][:, 0]                   # [B, 3, 3]
        euler = jnp.stack([math.pi - v_rot, -h_rot, -r_rot], axis=1)
        R3 = root_rotation @ euler_angles_to_matrix_xyz(euler)    # [B, 3, 3]
        R_raster = jnp.linalg.inv(R3)                             # torch.inverse(R)
        body_rotation = pad4(R3)
        world2cam = data["R"] @ data["T"] @ body_rotation
        cam2world = jnp.linalg.inv(world2cam.astype(jnp.float32))
        data = dict(data)
        data["cam2world_matrices"] = cam2world

        # ----------------- _forward_rasterize -------------------------------
        fov_raster = math.pi * 1 / 180
        focal_raster = 1.0 / math.tan(fov_raster / 2)
        t_raster = data["T"][:, :3, -1]
        t_raster = t_raster.at[:, -1].set(focal_raster / data["scales"] * 0.5)
        # TODO(synk): pytorch3d MeshRasterizer / PerspectiveCameras(R=R_raster,
        # T=t_raster) triangle rasterization has no Pallas equivalent; its
        # fragment outputs (pix_to_face, bary_coords) are taken as inputs here.
        _ = (R_raster, t_raster, focal_raster)

        sem, seg = rasterize_post_pallas(
            pix_to_face, bary_coords, self.smpl_faces, self.smpl_faces_to_labels,
            data["tpose_vertices"][0], self.height, self.width)
        data["rasterized_semantics"] = sem       # [B, 3, H, W] float32 (NCHW)
        data["rasterized_segments"] = seg        # [B, H, W] int32
        return data


# ------------------------------------ main -----------------------------------

if __name__ == "__main__":
    key = jax.random.PRNGKey(0)
    B, H, W = 2, 16, 16
    NV, NF, J = 64, 128, 4
    ks = jax.random.split(key, 12)

    # deterministic "buffers" (init_smpl equivalents)
    smpl_faces = jax.random.randint(ks[0], (NF, 3), 0, NV, dtype=jnp.int32)
    smpl_faces_to_labels = jax.random.randint(ks[1], (NF,), 0, 24, dtype=jnp.int32)

    def rand_rot(k, prefix):
        ang = jax.random.uniform(k, prefix + (3,), minval=-math.pi, maxval=math.pi)
        return euler_angles_to_matrix_xyz(ang)

    scales = jax.random.uniform(ks[2], (B,), minval=0.5, maxval=1.5)
    full_pose = rand_rot(ks[3], (B, J))                          # [B, J, 3, 3]
    r_cam = pad4(rand_rot(ks[4], (B,)))                          # [B, 4, 4]
    t_cam = jnp.tile(jnp.eye(4, dtype=jnp.float32), (B, 1, 1))
    t_cam = t_cam.at[:, :3, 3].set(jax.random.normal(ks[5], (B, 3)))
    tpose_vertices = jax.random.normal(ks[6], (B, NV, 3))
    vertices = jax.random.normal(ks[7], (B, NV, 3))

    data = dict(scales=scales, full_pose=full_pose, R=r_cam, T=t_cam,
                tpose_vertices=tpose_vertices, vertices=vertices)

    # Stand-in rasterizer fragments (would come from MeshRasterizer).
    p2f_fg = jax.random.randint(ks[8], (B, H, W), 0, B * NF, dtype=jnp.int32)
    bg_mask = jax.random.uniform(ks[9], (B, H, W)) < 0.3
    pix_to_face = jnp.where(bg_mask, -1, p2f_fg)
    bary = jax.random.uniform(ks[10], (B, H, W, 3))

    h_mean, v_mean = 0.3, math.pi / 2
    pre = SHHQPreprocessorPallas(H, W, smpl_faces, smpl_faces_to_labels)
    out = pre.forward(data, pix_to_face, bary, rotate=False,
                      h_mean=h_mean, v_mean=v_mean, h_stddev=0.2, v_stddev=0.1)
    out = jax.block_until_ready(out)

    # -------------------- plain-JAX reference check -------------------------
    euler_ref = jnp.stack([jnp.full((B,), math.pi - v_mean),
                           jnp.full((B,), -h_mean),
                           jnp.zeros((B,))], axis=1)
    body_ref = pad4(full_pose[:, 0] @ euler_angles_to_matrix_xyz(euler_ref))
    c2w_ref = jnp.linalg.inv(r_cam @ t_cam @ body_ref)
    assert jnp.allclose(out["cam2world_matrices"], c2w_ref, atol=1e-4, rtol=1e-4)

    f_ref = pix_to_face % NF
    verts_ref = smpl_faces[f_ref]                                 # [B, H, W, 3]
    k_idx = jnp.argmax(bary, axis=-1)
    vid_ref = jnp.take_along_axis(verts_ref, k_idx[..., None], axis=-1)[..., 0]
    sem_ref = tpose_vertices[0][vid_ref]
    sem_ref = jnp.where(bg_mask[..., None], 0.0, sem_ref)
    sem_ref = jnp.transpose(sem_ref, (0, 3, 1, 2))
    seg_ref = jnp.where(bg_mask, 1, smpl_faces_to_labels[f_ref] + 2)
    assert jnp.allclose(out["rasterized_semantics"], sem_ref, atol=1e-3, rtol=1e-3)
    assert bool(jnp.all(out["rasterized_segments"] == seg_ref))

    print("KERNEL_OK")
</pallas_src>

<mosaic_0001>
module attributes {stable_mosaic.version = 11 : i64} {
  func.func @kernel(%arg0: i32, %arg1: i32, %arg2: memref<1x1x256xi32, #tpu.memory_space<vmem>>, %arg3: memref<1x1x256xi32, #tpu.memory_space<vmem>>, %arg4: memref<1x24x256xbf16, #tpu.memory_space<vmem>>, %arg5: memref<1x3x256xf32, #tpu.memory_space<vmem>>, %arg6: memref<1x1x256xi32, #tpu.memory_space<vmem>>) attributes {dimension_semantics = [#tpu.dimension_semantics<parallel>, #tpu.dimension_semantics<parallel>], iteration_bounds = array<i64: 2, 1>, scalar_prefetch = 0 : i64, scratch_operands = 0 : i64, tpu.core_type = #tpu.core_type<tc>, window_params = [{transform_indices = @transform_0, window_bounds = array<i64: 1, 1, 256>}, {transform_indices = @transform_1, window_bounds = array<i64: 1, 1, 256>}, {pipeline_mode = #tpu.pipeline_mode<synchronous>, transform_indices = @transform_2, window_bounds = array<i64: 1, 24, 256>}, {transform_indices = @transform_3, window_bounds = array<i64: 1, 3, 256>}, {transform_indices = @transform_4, window_bounds = array<i64: 1, 1, 256>}]} {
    %c0 = arith.constant 0 : index
    %c0_0 = arith.constant 0 : index
    %c0_1 = arith.constant 0 : index
    %0 = vector.load %arg2[%c0, %c0_0, %c0_1] : memref<1x1x256xi32, #tpu.memory_space<vmem>>, vector<1x1x256xi32>
    %1 = vector.shape_cast %0 : vector<1x1x256xi32> to vector<1x256xi32>
    %c0_i32 = arith.constant 0 : i32
    %2 = vector.broadcast %c0_i32 : i32 to vector<1x256xi32>
    %3 = arith.cmpi slt, %1, %2 : vector<1x256xi32>
    %c128_i32 = arith.constant 128 : i32
    %c0_i32_2 = arith.constant 0 : i32
    %4 = arith.cmpi eq, %c128_i32, %c0_i32_2 : i32
    %c1_i32 = arith.constant 1 : i32
    %5 = arith.select %4, %c1_i32, %c128_i32 : i32
    %6 = vector.broadcast %5 : i32 to vector<1x256xi32>
    %7 = arith.remsi %1, %6 : vector<1x256xi32>
    %c0_i32_3 = arith.constant 0 : i32
    %8 = vector.broadcast %c0_i32_3 : i32 to vector<1x256xi32>
    %9 = arith.cmpi ne, %7, %8 : vector<1x256xi32>
    %c0_i32_4 = arith.constant 0 : i32
    %10 = vector.broadcast %c0_i32_4 : i32 to vector<1x256xi32>
    %11 = arith.cmpi slt, %7, %10 : vector<1x256xi32>
    %c0_i32_5 = arith.constant 0 : i32
    %12 = arith.cmpi slt, %5, %c0_i32_5 : i32
    %13 = vector.broadcast %12 : i1 to vector<1x256xi1>
    %14 = vector.broadcast %13 : vector<1x256xi1> to vector<1x256xi1>
    %15 = arith.xori %11, %14 : vector<1x256xi1>
    %16 = arith.andi %15, %9 : vector<1x256xi1>
    %17 = vector.broadcast %5 : i32 to vector<1x256xi32>
    %18 = arith.addi %7, %17 : vector<1x256xi32>
    %19 = arith.select %16, %18, %7 : vector<1x256xi1>, vector<1x256xi32>
    %20 = tpu.iota {dimensions = array<i32: 0>} : vector<256x256xi32>
    %cst = arith.constant 0.000000e+00 : f32
    %21 = vector.broadcast %cst : f32 to vector<24x256xf32>
    %c0_6 = arith.constant 0 : index
    %c0_7 = arith.constant 0 : index
    %c0_8 = arith.constant 0 : index
    %22 = vector.load %arg4[%c0_6, %c0_7, %c0_8] : memref<1x24x256xbf16, #tpu.memory_space<vmem>>, vector<1x24x256xbf16>
    %23 = vector.shape_cast %22 : vector<1x24x256xbf16> to vector<24x256xbf16>
    %c0_i32_9 = arith.constant 0 : i32
    %24 = vector.broadcast %c0_i32_9 : i32 to vector<1x256xi32>
    %25 = arith.subi %19, %24 : vector<1x256xi32>
    %26 = vector.broadcast %25 : vector<1x256xi32> to vector<256x256xi32>
    %27 = arith.cmpi eq, %20, %26 : vector<256x256xi32>
    %28 = arith.extui %27 : vector<256x256xi1> to vector<256x256xi32>
    %29 = arith.sitofp %28 : vector<256x256xi32> to vector<256x256xf32>
    %30 = arith.truncf %29 : vector<256x256xf32> to vector<256x256xbf16>
    %cst_10 = arith.constant dense<0.000000e+00> : vector<24x256xf32>
    %31 = tpu.matmul %23, %30, %cst_10 {dimension_numbers = #tpu.dot_dimension_numbers<[1], [0], [0], [1], [0, 0, 1, 1], [], []>} : vector<24x256xbf16>, vector<256x256xbf16>, vector<24x256xf32> -> vector<24x256xf32>
    %32 = arith.addf %21, %31 : vector<24x256xf32>
    %33 = vector.extract_strided_slice %32 {offsets = [0, 0], sizes = [9, 256], strides = [1, 1]} : vector<24x256xf32> to vector<9x256xf32>
    %34 = vector.extract_strided_slice %32 {offsets = [9, 0], sizes = [9, 256], strides = [1, 1]} : vector<24x256xf32> to vector<9x256xf32>
    %35 = arith.addf %33, %34 : vector<9x256xf32>
    %c0_11 = arith.constant 0 : index
    %c0_12 = arith.constant 0 : index
    %c0_13 = arith.constant 0 : index
    %36 = vector.load %arg3[%c0_11, %c0_12, %c0_13] : memref<1x1x256xi32, #tpu.memory_space<vmem>>, vector<1x1x256xi32>
    %37 = vector.shape_cast %36 : vector<1x1x256xi32> to vector<1x256xi32>
    %c0_i32_14 = arith.constant 0 : i32
    %38 = vector.broadcast %c0_i32_14 : i32 to vector<1x256xi32>
    %39 = arith.cmpi eq, %37, %38 : vector<1x256xi32>
    %40 = vector.extract_strided_slice %35 {offsets = [0, 0], sizes = [3, 256], strides = [1, 1]} : vector<9x256xf32> to vector<3x256xf32>
    %c1_i32_15 = arith.constant 1 : i32
    %41 = vector.broadcast %c1_i32_15 : i32 to vector<1x256xi32>
    %42 = arith.cmpi eq, %37, %41 : vector<1x256xi32>
    %43 = vector.extract_strided_slice %35 {offsets = [3, 0], sizes = [3, 256], strides = [1, 1]} : vector<9x256xf32> to vector<3x256xf32>
    %44 = vector.extract_strided_slice %35 {offsets = [6, 0], sizes = [3, 256], strides = [1, 1]} : vector<9x256xf32> to vector<3x256xf32>
    %45 = vector.shape_cast %42 : vector<1x256xi1> to vector<1x256xi1>
    %46 = vector.broadcast %45 : vector<1x256xi1> to vector<3x256xi1>
    %47 = arith.select %46, %43, %44 : vector<3x256xi1>, vector<3x256xf32>
    %48 = vector.shape_cast %39 : vector<1x256xi1> to vector<1x256xi1>
    %49 = vector.broadcast %48 : vector<1x256xi1> to vector<3x256xi1>
    %50 = arith.select %49, %40, %47 : vector<3x256xi1>, vector<3x256xf32>
    %cst_16 = arith.constant 0.000000e+00 : f32
    %51 = vector.shape_cast %3 : vector<1x256xi1> to vector<1x256xi1>
    %52 = vector.broadcast %51 : vector<1x256xi1> to vector<3x256xi1>
    %53 = vector.broadcast %cst_16 : f32 to vector<3x256xf32>
    %54 = arith.select %52, %53, %50 : vector<3x256xi1>, vector<3x256xf32>
    %c0_17 = arith.constant 0 : index
    %c0_18 = arith.constant 0 : index
    %c0_19 = arith.constant 0 : index
    %55 = vector.load %arg5[%c0_17, %c0_18, %c0_19] : memref<1x3x256xf32, #tpu.memory_space<vmem>>, vector<1x3x256xf32>
    %56 = vector.shape_cast %55 : vector<1x3x256xf32> to vector<3x256xf32>
    %57 = vector.shape_cast %54 : vector<3x256xf32> to vector<1x3x256xf32>
    tpu.vector_store %arg5[%c0_17, %c0_18, %c0_19], %57 {strides = array<i32>} : memref<1x3x256xf32, #tpu.memory_space<vmem>>, vector<1x3x256xf32>,
    %58 = vector.extract_strided_slice %32 {offsets = [18, 0], sizes = [1, 256], strides = [1, 1]} : vector<24x256xf32> to vector<1x256xf32>
    %cst_20 = arith.constant 5.000000e-01 : f32
    %59 = vector.broadcast %cst_20 : f32 to vector<1x256xf32>
    %60 = arith.addf %58, %59 : vector<1x256xf32>
    %61 = arith.fptosi %60 : vector<1x256xf32> to vector<1x256xi32>
    %c2_i32 = arith.constant 2 : i32
    %62 = vector.broadcast %c2_i32 : i32 to vector<1x256xi32>
    %63 = arith.addi %61, %62 : vector<1x256xi32>
    %c1_i32_21 = arith.constant 1 : i32
    %64 = vector.broadcast %c1_i32_21 : i32 to vector<1x256xi32>
    %65 = arith.select %3, %64, %63 : vector<1x256xi1>, vector<1x256xi32>
    %c0_22 = arith.constant 0 : index
    %c0_23 = arith.constant 0 : index
    %c0_24 = arith.constant 0 : index
    %66 = vector.load %arg6[%c0_22, %c0_23, %c0_24] : memref<1x1x256xi32, #tpu.memory_space<vmem>>, vector<1x1x256xi32>
    %67 = vector.shape_cast %66 : vector<1x1x256xi32> to vector<1x256xi32>
    %68 = vector.shape_cast %65 : vector<1x256xi32> to vector<1x1x256xi32>
    tpu.vector_store %arg6[%c0_22, %c0_23, %c0_24], %68 {strides = array<i32>} : memref<1x1x256xi32, #tpu.memory_space<vmem>>, vector<1x1x256xi32>,
    return
  }
  func.func @transform_0(%arg0: i32, %arg1: i32) -> (i32, i32, i32) {
    %c0_i32 = arith.constant 0 : i32
    %c0_i32_0 = arith.constant 0 : i32
    return %arg0, %c0_i32, %arg1 : i32, i32, i32
  }
  func.func @transform_1(%arg0: i32, %arg1: i32) -> (i32, i32, i32) {
    %c0_i32 = arith.constant 0 : i32
    %c0_i32_0 = arith.constant 0 : i32
    return %arg0, %c0_i32, %arg1 : i32, i32, i32
  }
  func.func @transform_2(%arg0: i32, %arg1: i32) -> (i32, i32, i32) {
    %c0_i32 = arith.constant 0 : i32
    %c0_i32_0 = arith.constant 0 : i32
    %c0_i32_1 = arith.constant 0 : i32
    %c0_i32_2 = arith.constant 0 : i32
    return %c0_i32, %c0_i32_0, %c0_i32_1 : i32, i32, i32
  }
  func.func @transform_3(%arg0: i32, %arg1: i32) -> (i32, i32, i32) {
    %c0_i32 = arith.constant 0 : i32
    %c0_i32_0 = arith.constant 0 : i32
    return %arg0, %c0_i32, %arg1 : i32, i32, i32
  }
  func.func @transform_4(%arg0: i32, %arg1: i32) -> (i32, i32, i32) {
    %c0_i32 = arith.constant 0 : i32
    %c0_i32_0 = arith.constant 0 : i32
    return %arg0, %c0_i32, %arg1 : i32, i32, i32
  }
}

</mosaic_0001>

<bundles_post_ra>
// kernel: tpu_custom_call.1
= control target key start
LH: loop header
LB: loop body
LE: loop exit
PB: predicated region body
PF: predicated region fallthrough
CT: control target
= control target key end

     0   :  { %s1780_s0 = inlined_call_operand.hbm [shape: s32[2,1,256], index: 0, kind: input, shape index: {}]   ;;  %s1781_s1 = inlined_call_operand.hbm [shape: s32[2,1,256], index: 1, kind: input, shape index: {}]   ;;  %s1782_s2 = inlined_call_operand.hbm [shape: bf16[1,24,256], index: 2, kind: input, shape index: {}]   ;;  %s1783_s3 = inlined_call_operand.vmem [shape: f32[2,3,256], index: 3, kind: output, shape index: {0}]   ;;  %s1784_s4 = inlined_call_operand.hbm [shape: s32[2,1,256], index: 4, kind: output, shape index: {1}]  }
   0x1   :  { %1788 = sst [smem:[#allocation17_spill]] %s1782_s2 }
   0x2   :  { %10 = vsyncpa [#allocation3], 0 }
   0x3   :  { %12 = vsyncpa [#allocation3 + $0x1], 0 }
   0x4   :  { %13 = vsyncpa [#allocation6], 0 }
   0x5   :  { %15 = vsyncpa [#allocation6 + $0x1], 0 }
   0x6   :  { %16 = vsyncpa [#allocation4], 0 }
   0x7   :  { %18 = vsyncpa [#allocation4 + $0x1], 0  ;;  %s1416_s15 = smov 0   ;;  %s1418_s16 = smov 0  }
   0x8   :  { %s1420_s17 = smov 0   ;;  %s1422_s18 = smov 0  }
   0x9   :  { %s1424_s19 = smov 0   ;;  %s1426_s20 = smov 0  }
   0xa LB: > { %1789 = sst [smem:[#allocation13_spill]] %s1372_s17  ;;  %s1447_s21 = sadd.s32 4294967295, %s1384_s20   ;;  %s1384_s20 = sphi %s1426_s20, %s24_s20   ;;  %s1380_s19 = sphi %s1424_s19, %s1806_s19   ;;  %s1376_s18 = sphi %s1422_s18, %s1805_s18   ;;  %s1372_s17 = sphi %s1420_s17, %s1804_s17   ;;  %s1368_s16 = sphi %s1418_s16, %s1808_s16   ;;  %s1364_s15 = sphi %s1416_s15, %s1807_s15  }
   0xb   : > { %1790 = sst [smem:[#allocation14_spill]] %s1380_s19  ;;  %p955_p0 = scmp.ge.s32.totalorder %s1384_s20, 1 }
   0xc   : > { %p59_p1 = scmp.eq.s32.totalorder %s1447_s21, 0  ;;  %p174_p2 = scmp.lt.s32.totalorder %s1384_s20, 3 }
   0xd   : > { %s1791_s2 = sld [smem:[#allocation17_spill]]  ;;  %s1386_s26 = smov [#allocation7]  }
   0xe   : > { %p1455_p3 = pnand %p955_p0, %p174_p2  ;;  %s187_s27 = sshll.u32 %s1386_s26, 4  ;;  %s188_s27 = int_to_ptr.vmem [resolvable:$true] %s187_s27 }
   0xf   : > { %p957_p6 = scmp.ge.s32.totalorder %s1384_s20, 2  ;;  %s1387_s28 = smov 128  }
  0x10   : > { %p1132_p4 = pneg %p1455_p3  ;;  %s1388_s29 = smov 8  }
  0x11   : > { %s954_s30 = sadd.s32 4294967294, %s1384_s20   ;;  %s36_s5 = sadd.s32 1, %s1380_s19 }
  0x12   : > { %p1133_p5 = pnand %p1132_p4, %p59_p1  ;;  %s45_s6 = sadd.s32 1, %s1372_s17 }
  0x13   : > { %s185_s24 = sshll.u32 %s1791_s2, 4  ;;  %p38_p7 = scmp.ge.s32.totalorder %s36_s5, 2  ;;  %s186_s24 = int_to_ptr.hbm [resolvable:$true] %s185_s24 }
  0x14   : > { %1135 = dma.hbm_to_vmem [thread:$0]  (!%p1133_p5), %s186_s24, 384, %s188_s27, [#allocation6], %s1387_s28, %s1387_s28, %s1388_s29  }
  0x15   : > { %p52_p8 = scmp.ne.s32.totalorder %s1372_s17, %s1368_s16  ;;  %p53_p9 = scmp.eq.s32.totalorder %s1384_s20, 0 }
  0x16   : > { %p58_p10 = scmp.ne.s32.totalorder %s1368_s16, %s1364_s15  ;;  %s1810_s5 = smov (%p38_p7, %s36_s5), 0 }
  0x17   : > { %1793 = sst [smem:[#allocation15_spill]] %s1810_s5  ;;  %p1474_p11 = por %p53_p9, %p52_p8 }
  0x18   : > { %p1480_p12 = por %p59_p1, %p58_p10  ;;  %s40_s9 = ssub.s32 %s1380_s19, %s1810_s5 }
  0x19   : > { %p161_p13 = scmp.eq.s32.totalorder %s1447_s21, 1  ;;  %p43_p0 = scmp.eq.s32.totalorder %s40_s9, 0 }
  0x1a   : > { %p167_p2 = scmp.eq.s32.totalorder %s954_s30, 1  ;;  %p1148_p5 = scmp.lt.s32.totalorder %s1384_s20, 2 }
  0x1b   : > { %p1487_p4 = por %p161_p13, %p52_p8  ;;  %s201_s13 = sand.u32 1, %s1372_s17  }
  0x1c   : > { %s1493_s11 = scalar_select %p43_p0, %s1372_s17, %s45_s6  }
  0x1d   : > { %p1495_p7 = por %p167_p2, %p58_p10  ;;  %s958_s14 = sshll.u32 %s201_s13, 1 }
  0x1e   : > { %1797 = sst [smem:[#allocation16_spill]] %s1493_s11  ;;  %s959_s22 = sshll.u32 %s1380_s19, 1 }
  0x1f   : > { %s211_s26 = scalar_lea.hbm %s1780_s0, %s959_s22  ;;  %s205_s27 = scalar_lea.vmem [#allocation2], %s958_s14 }
  0x20   : > { %s215_s28 = sshll.u32 %s205_s27, 4  ;;  %s213_s29 = sshll.u32 %s211_s26, 4  ;;  %s216_s28 = int_to_ptr.vmem [resolvable:$true] %s215_s28  ;;  %s214_s29 = int_to_ptr.hbm [resolvable:$true] %s213_s29 }
  0x21   : > { %p1137_p8 = pnand %p1148_p5, %p1474_p11  ;;  %s232_s9 = scalar_lea.hbm %s1781_s1, %s959_s22 }
  0x22   : > { %s222_s2 = sand.u32 1, %s1384_s20   ;;  %s202_s5 = scalar_lea.sflag [#allocation3], %s201_s13 }
  0x23   : > { %1139 = dma.hbm_to_vmem [thread:$0]  (!%p1137_p8), %s214_s29, 32, %s216_s28, %s202_s5  }
  0x24   : > { %s234_s11 = sshll.u32 %s232_s9, 4  ;;  %s226_s19 = scalar_lea.vmem [#allocation5], %s958_s14  ;;  %s235_s11 = int_to_ptr.hbm [resolvable:$true] %s234_s11 }
  0x25   : > { %s236_s17 = sshll.u32 %s226_s19, 4  ;;  %s223_s23 = scalar_lea.sflag [#allocation6], %s222_s2  ;;  %s237_s17 = int_to_ptr.vmem [resolvable:$true] %s236_s17 }
  0x26   : > { %1142 = dma.hbm_to_vmem [thread:$0]  (!%p1137_p8), %s235_s11, 32, %s237_s17, %s223_s23  }
  0x27   : > { %245 = sbr.rel (%p1455_p3) target bundleno = 272 (0x110), region = 32  ;;  %s1513_s7 = sand.u32 (!%p1455_p3), 1, %s1368_s16  }
  0x28   : > { %s1516_s22 = sshll.u32 (!%p1455_p3), %s1513_s7, 1  ;;  %s248_s5 = scalar_lea.sflag (!%p1455_p3), [#allocation3], %s1513_s7 }
  0x29   : > { %s251_s13 = scalar_lea.vmem (!%p1455_p3), [#allocation2], %s1516_s22 }
  0x2c   : > { %1347 = dma.done.wait (%p1480_p12), %s248_s5, 32  }
  0x2d   : > { %1349 = vsyncadd (%p1480_p12), %s248_s5, 4294967264  ;;  %s257_s2 = sand.u32 1, %s1447_s21   ;;  %s261_s19 = scalar_lea.vmem [#allocation5], %s1516_s22 }
  0x2e   : > { %s258_s17 = scalar_lea.sflag [#allocation6], %s257_s2 }
  0x2f   : > { %1351 = dma.done.wait (%p1480_p12), %s258_s17, 32  }
  0x30   : > { %1353 = vsyncadd (%p1480_p12), %s258_s17, 4294967264 }
  0x31   : > { %1355 = dma.done.wait (%p59_p1), [#allocation6], 384  }
  0x32   : > { %1357 = vsyncadd (%p59_p1), [#allocation6], 4294966912  ;;  %v1534_v0 = vld [vmem:[%s251_s13] sm:$0x3]  ;;  %v333_v2 = vlaneseq  ;;  %v1389_v20 = vmov 1.0|1.0  }
  0x33   : > { %vm320_vm0 = vcmp.lt.s32.totalorder %v1534_v0, 0  ;;  %v322_v1 = vsub.s32 0, %v1534_v0  ;;  %v1035_v44 = vld [vmem:[#allocation7] sm:$0xf]  ;;  %v1111_v45 = vld [vmem:[#allocation7 + $0x4] sm:$0xf0] }
  0x34   : > { %v1542_v6 = vshrl.u32 %v333_v2, 7  ;;  %v1110_v46 = vld [vmem:[#allocation7 + $0x4] sm:$0xf]  ;;  %v1037_v47 = vld [vmem:[#allocation7 + $0x8] sm:$0xf0]  ;;  %v1036_v48 = vor.u32 %v1111_v45, %v1035_v44  ;;  %v368_v50 = vld [vmem:[#allocation7 + $0x10] sm:$0xff] }
  0x35   : > { %v323_v3 = vsel %vm320_vm0, %v322_v1, %v1534_v0  ;;  %v1040_v49 = vor.u32 %v1110_v46, %v1037_v47  ;;  %v602_v51 = vunpack.c.l.b16 %v368_v50  ;;  %v603_v52 = vunpack.c.h.b16 %v368_v50  ;;  %v703_v61 = vld [vmem:[%s261_s19] sm:$0x3]  ;;  %p309_p1 = scmp.lt.s32.totalorder %s1376_s18, 1  ;;  %s1106_s25 = sshll.u32 %s1376_s18, 1 }
  0x36   : > { %v325_v4 = vand.u32 127, %v323_v3  ;;  %v348_v9 = vadd.s32 112, %v1542_v6  ;;  %v349_v10 = vadd.s32 120, %v1542_v6  ;;  %v364_v11 = vadd.s32 240, %v1542_v6  ;;  %s795_s24 = scalar_lea.hbm %s1784_s4, %s1106_s25  ;;  %s305_s28 = scalar_lea.vmem [#allocation8], %s1516_s22 }
  0x37   : > { %v365_v12 = vadd.s32 248, %v1542_v6  ;;  %v346_v16 = vadd.s32 96, %v1542_v6  ;;  %v347_v17 = vadd.s32 104, %v1542_v6  ;;  %v362_v18 = vadd.s32 224, %v1542_v6  ;;  %s310_s21 = scalar_select %p309_p1, %s1376_s18, 1 }
  0x38   : > { %v326_v5 = vsub.s32 0, %v325_v4  ;;  %v363_v19 = vadd.s32 232, %v1542_v6  ;;  %v344_v21 = vadd.s32 80, %v1542_v6  ;;  %v345_v22 = vadd.s32 88, %v1542_v6  ;;  %s797_s29 = sshll.u32 %s305_s28, 4  ;;  %s799_s30 = sshll.u32 %s795_s24, 4  ;;  %s798_s29 = int_to_ptr.vmem [resolvable:$true] %s797_s29  ;;  %s800_s30 = int_to_ptr.hbm [resolvable:$true] %s799_s30 }
  0x39   : > { %v360_v23 = vadd.s32 208, %v1542_v6  ;;  %v361_v24 = vadd.s32 216, %v1542_v6  ;;  %v342_v25 = vadd.s32 64, %v1542_v6  ;;  %v343_v26 = vadd.s32 72, %v1542_v6  ;;  %s1109_s8 = sshll.u32 %s310_s21, 3  ;;  %s779_s6 = scalar_lea.sflag [#allocation4], %s1513_s7 }
  0x3a   : > { %v327_v7 = vsel %vm320_vm0, %v326_v5, %v325_v4  ;;  %v358_v27 = vadd.s32 192, %v1542_v6  ;;  %v359_v28 = vadd.s32 200, %v1542_v6  ;;  %v340_v29 = vadd.s32 48, %v1542_v6  ;;  %s316_s18 = scalar_lea.vmem %s1783_s3, %s1109_s8  ;;  %s1308_s9 = sshra.s32 %s800_s30, 4  ;;  %s1309_s9 = int_to_ptr.hbm [resolvable:$true] %s1308_s9 }
  0x3b   : > { %vm328_vm1 = vcmp.ne.s32.totalorder %v327_v7, 0  ;;  %vm329_vm2 = vcmp.lt.s32.totalorder %v327_v7, 0  ;;  %v331_v8 = vadd.s32 128, %v327_v7  ;;  %v341_v30 = vadd.s32 56, %v1542_v6  ;;  %s1310_s23 = scalar_lea.hbm %s1309_s9, 2  ;;  %s1314_s13 = scalar_lea.hbm %s1784_s4, 4 }
  0x3c   : > { %vm330_vm3 = vmand %vm329_vm2, %vm328_vm1  ;;  %v356_v31 = vadd.s32 176, %v1542_v6  ;;  %v357_v32 = vadd.s32 184, %v1542_v6  ;;  %v338_v33 = vadd.s32 32, %v1542_v6  ;;  %v339_v34 = vadd.s32 40, %v1542_v6  ;;  %p1311_p3 = scmp.ne.s32.totalorder %s1309_s9, %s1310_s23  ;;  %p1315_p11 = scmp.lt.s32.totalorder %s1309_s9, %s1784_s4 }
  0x3d   : > { %v332_v13 = vsel %vm330_vm3, %v331_v8, %v327_v7  ;;  %v354_v35 = vadd.s32 160, %v1542_v6  ;;  %v355_v36 = vadd.s32 168, %v1542_v6  ;;  %v336_v37 = vadd.s32 16, %v1542_v6  ;;  %p1316_p12 = scmp.lt.s32.totalorder %s1314_s13, %s1310_s23 }
  0x3e   : > { %v1550_v14 = vperm.slane %v332_v13, 0  ;;  %v1552_v15 = vperm.slane %v332_v13, 1  ;;  %v337_v38 = vadd.s32 24, %v1542_v6  ;;  %v352_v39 = vadd.s32 144, %v1542_v6  ;;  %p1312_p9 = pnand %p1311_p3, %p1487_p4 }
  0x3f   : > { %v353_v40 = vadd.s32 152, %v1542_v6  ;;  %v335_v41 = vadd.s32 8, %v1542_v6  ;;  %v350_v42 = vadd.s32 128, %v1542_v6  ;;  %v351_v43 = vadd.s32 136, %v1542_v6  ;;  %p1317_p13 = por %p1316_p12, %p1315_p11 }
  0x40   : > { %vm399_vm4 = vcmp.eq.s32.totalorder %v348_v9, %v1550_v14  ;;  %vm401_vm5 = vcmp.eq.s32.totalorder %v349_v10, %v1550_v14  ;;  %vm431_vm6 = vcmp.eq.s32.totalorder %v364_v11, %v1550_v14  ;;  %vm433_vm7 = vcmp.eq.s32.totalorder %v365_v12, %v1550_v14  ;;  %p1313_p10 = pneg %p1312_p9 }
  0x41   : > { %vm1041_vm8 = vmpackc.low %vm401_vm5, %vm399_vm4  ;;  %vm400_vm9 = vcmp.eq.s32.totalorder %v348_v9, %v1552_v15  ;;  %vm402_vm10 = vcmp.eq.s32.totalorder %v349_v10, %v1552_v15  ;;  %vm432_vm11 = vcmp.eq.s32.totalorder %v364_v11, %v1552_v15  ;;  %vm434_vm12 = vcmp.eq.s32.totalorder %v365_v12, %v1552_v15 }
  0x42   : > { %1042 = vmatpush.bf16.msk.msra.mxu0 %vm1041_vm8, %v1389_v20  ;;  %vm1057_vm13 = vmpackc.low %vm433_vm7, %vm431_vm6  ;;  %vm395_vm14 = vcmp.eq.s32.totalorder %v346_v16, %v1550_v14  ;;  %vm397_vm15 = vcmp.eq.s32.totalorder %v347_v17, %v1550_v14  ;;  %vm427_vm2 = vcmp.eq.s32.totalorder %v362_v18, %v1550_v14  ;;  %vm429_vm3 = vcmp.eq.s32.totalorder %v363_v19, %v1550_v14  ;;  %p1318_p0 = pnand %p1317_p13, %p1313_p10 }
  0x43   : > { %1058 = vmatpush.bf16.msk.msra.mxu1 %vm1057_vm13, %v1389_v20  ;;  %vm1073_vm1 = vmpackc.low %vm402_vm10, %vm400_vm9  ;;  %vm396_vm5 = vcmp.eq.s32.totalorder %v346_v16, %v1552_v15  ;;  %vm398_vm6 = vcmp.eq.s32.totalorder %v347_v17, %v1552_v15  ;;  %vm428_vm8 = vcmp.eq.s32.totalorder %v362_v18, %v1552_v15  ;;  %vm430_vm9 = vcmp.eq.s32.totalorder %v363_v19, %v1552_v15 }
  0x44   : > { %1074 = vmatpush.bf16.msk.msra.mxu2 %vm1073_vm1, %v1389_v20  ;;  %vm1089_vm4 = vmpackc.low %vm434_vm12, %vm432_vm11  ;;  %vm391_vm13 = vcmp.eq.s32.totalorder %v344_v21, %v1550_v14  ;;  %vm393_vm11 = vcmp.eq.s32.totalorder %v345_v22, %v1550_v14  ;;  %v606_v53 = vpack.c.b16 %v602_v51, %v602_v51  ;;  %v607_v54 = vpack.c.b16 %v603_v52, %v603_v52 }
  0x45   : > { %1090 = vmatpush.bf16.msk.msra.mxu3 %vm1089_vm4, %v1389_v20  ;;  %vm1043_vm7 = vmpackc.low %vm397_vm15, %vm395_vm14  ;;  %vm423_vm14 = vcmp.eq.s32.totalorder %v360_v23, %v1550_v14  ;;  %vm425_vm15 = vcmp.eq.s32.totalorder %v361_v24, %v1550_v14  ;;  %v1390_v10 = vmov 0  }
  0x46   : > { %1044 = vmatpush.bf16.msk.msra.mxu0 %vm1043_vm7, %v1389_v20  ;;  %vm1059_vm10 = vmpackc.low %vm429_vm3, %vm427_vm2  ;;  %vm392_vm2 = vcmp.eq.s32.totalorder %v344_v21, %v1552_v15  ;;  %vm394_vm3 = vcmp.eq.s32.totalorder %v345_v22, %v1552_v15  ;;  %v739_v44 = vsel %vm320_vm0, 1, %v1390_v10 }
  0x47   : > { %1060 = vmatpush.bf16.msk.msra.mxu1 %vm1059_vm10, %v1389_v20  ;;  %vm1075_vm12 = vmpackc.low %vm398_vm6, %vm396_vm5  ;;  %vm424_vm5 = vcmp.eq.s32.totalorder %v360_v23, %v1552_v15  ;;  %vm426_vm6 = vcmp.eq.s32.totalorder %v361_v24, %v1552_v15  ;;  %vm387_vm10 = vcmp.eq.s32.totalorder %v342_v25, %v1550_v14 }
  0x48   : > { %1076 = vmatpush.bf16.msk.msra.mxu2 %vm1075_vm12, %v1389_v20  ;;  %vm1091_vm1 = vmpackc.low %vm430_vm9, %vm428_vm8  ;;  %vm389_vm8 = vcmp.eq.s32.totalorder %v343_v26, %v1550_v14 }
  0x49   : > { %1092 = vmatpush.bf16.msk.msra.mxu3 %vm1091_vm1, %v1389_v20  ;;  %vm1045_vm4 = vmpackc.low %vm393_vm11, %vm391_vm13  ;;  %vm419_vm13 = vcmp.eq.s32.totalorder %v358_v27, %v1550_v14  ;;  %vm421_vm11 = vcmp.eq.s32.totalorder %v359_v28, %v1550_v14 }
  0x4a   : > { %1046 = vmatpush.bf16.msk.msra.mxu0 %vm1045_vm4, %v1389_v20  ;;  %vm1061_vm7 = vmpackc.low %vm425_vm15, %vm423_vm14  ;;  %vm388_vm14 = vcmp.eq.s32.totalorder %v342_v25, %v1552_v15  ;;  %vm390_vm15 = vcmp.eq.s32.totalorder %v343_v26, %v1552_v15 }
  0x4b   : > { %1062 = vmatpush.bf16.msk.msra.mxu1 %vm1061_vm7, %v1389_v20  ;;  %vm1077_vm9 = vmpackc.low %vm394_vm3, %vm392_vm2  ;;  %vm420_vm2 = vcmp.eq.s32.totalorder %v358_v27, %v1552_v15  ;;  %vm422_vm3 = vcmp.eq.s32.totalorder %v359_v28, %v1552_v15  ;;  %vm383_vm7 = vcmp.eq.s32.totalorder %v340_v29, %v1550_v14 }
  0x4c   : > { %1078 = vmatpush.bf16.msk.msra.mxu2 %vm1077_vm9, %v1389_v20  ;;  %vm1093_vm12 = vmpackc.low %vm426_vm6, %vm424_vm5  ;;  %vm385_vm5 = vcmp.eq.s32.totalorder %v341_v30, %v1550_v14 }
  0x4d   : > { %1094 = vmatpush.bf16.msk.msra.mxu3 %vm1093_vm12, %v1389_v20  ;;  %vm1047_vm1 = vmpackc.low %vm389_vm8, %vm387_vm10  ;;  %vm415_vm10 = vcmp.eq.s32.totalorder %v356_v31, %v1550_v14  ;;  %vm417_vm8 = vcmp.eq.s32.totalorder %v357_v32, %v1550_v14 }
  0x4e   : > { %1048 = vmatpush.bf16.msk.msra.mxu0 %vm1047_vm1, %v1389_v20  ;;  %vm1063_vm4 = vmpackc.low %vm421_vm11, %vm419_vm13  ;;  %vm384_vm13 = vcmp.eq.s32.totalorder %v340_v29, %v1552_v15  ;;  %vm386_vm11 = vcmp.eq.s32.totalorder %v341_v30, %v1552_v15 }
  0x4f   : > { %1064 = vmatpush.bf16.msk.msra.mxu1 %vm1063_vm4, %v1389_v20  ;;  %vm1079_vm6 = vmpackc.low %vm390_vm15, %vm388_vm14  ;;  %vm416_vm14 = vcmp.eq.s32.totalorder %v356_v31, %v1552_v15  ;;  %vm418_vm15 = vcmp.eq.s32.totalorder %v357_v32, %v1552_v15  ;;  %vm379_vm4 = vcmp.eq.s32.totalorder %v338_v33, %v1550_v14 }
  0x50   : > { %1080 = vmatpush.bf16.msk.msra.mxu2 %vm1079_vm6, %v1389_v20  ;;  %vm1095_vm9 = vmpackc.low %vm422_vm3, %vm420_vm2  ;;  %vm381_vm2 = vcmp.eq.s32.totalorder %v339_v34, %v1550_v14 }
  0x51   : > { %1096 = vmatpush.bf16.msk.msra.mxu3 %vm1095_vm9, %v1389_v20  ;;  %vm1049_vm12 = vmpackc.low %vm385_vm5, %vm383_vm7  ;;  %vm411_vm7 = vcmp.eq.s32.totalorder %v354_v35, %v1550_v14  ;;  %vm413_vm5 = vcmp.eq.s32.totalorder %v355_v36, %v1550_v14 }
  0x52   : > { %1050 = vmatpush.bf16.msk.msra.mxu0 %vm1049_vm12, %v1389_v20  ;;  %vm1065_vm1 = vmpackc.low %vm417_vm8, %vm415_vm10  ;;  %vm380_vm10 = vcmp.eq.s32.totalorder %v338_v33, %v1552_v15  ;;  %vm382_vm8 = vcmp.eq.s32.totalorder %v339_v34, %v1552_v15 }
  0x53   : > { %1066 = vmatpush.bf16.msk.msra.mxu1 %vm1065_vm1, %v1389_v20  ;;  %vm1081_vm3 = vmpackc.low %vm386_vm11, %vm384_vm13  ;;  %vm412_vm13 = vcmp.eq.s32.totalorder %v354_v35, %v1552_v15  ;;  %vm414_vm11 = vcmp.eq.s32.totalorder %v355_v36, %v1552_v15  ;;  %vm375_vm1 = vcmp.eq.s32.totalorder %v336_v37, %v1550_v14 }
  0x54   : > { %1082 = vmatpush.bf16.msk.msra.mxu2 %vm1081_vm3, %v1389_v20  ;;  %vm1097_vm6 = vmpackc.low %vm418_vm15, %vm416_vm14  ;;  %vm377_vm14 = vcmp.eq.s32.totalorder %v337_v38, %v1550_v14  ;;  %vm407_vm3 = vcmp.eq.s32.totalorder %v352_v39, %v1550_v14 }
  0x55   : > { %1098 = vmatpush.bf16.msk.msra.mxu3 %vm1097_vm6, %v1389_v20  ;;  %vm1051_vm9 = vmpackc.low %vm381_vm2, %vm379_vm4  ;;  %vm409_vm4 = vcmp.eq.s32.totalorder %v353_v40, %v1550_v14 }
  0x56   : > { %1052 = vmatpush.bf16.msk.msra.mxu0 %vm1051_vm9, %v1389_v20  ;;  %vm1067_vm12 = vmpackc.low %vm413_vm5, %vm411_vm7  ;;  %vm376_vm7 = vcmp.eq.s32.totalorder %v336_v37, %v1552_v15  ;;  %vm378_vm5 = vcmp.eq.s32.totalorder %v337_v38, %v1552_v15 }
  0x57   : > { %1068 = vmatpush.bf16.msk.msra.mxu1 %vm1067_vm12, %v1389_v20  ;;  %vm1083_vm15 = vmpackc.low %vm382_vm8, %vm380_vm10  ;;  %vm408_vm10 = vcmp.eq.s32.totalorder %v352_v39, %v1552_v15  ;;  %vm410_vm8 = vcmp.eq.s32.totalorder %v353_v40, %v1552_v15  ;;  %vm371_vm12 = vcmp.eq.s32.totalorder %v1542_v6, %v1550_v14 }
  0x58   : > { %1084 = vmatpush.bf16.msk.msra.mxu2 %vm1083_vm15, %v1389_v20  ;;  %vm1099_vm2 = vmpackc.low %vm414_vm11, %vm412_vm13  ;;  %vm373_vm15 = vcmp.eq.s32.totalorder %v335_v41, %v1550_v14  ;;  %vm403_vm11 = vcmp.eq.s32.totalorder %v350_v42, %v1550_v14 }
  0x59   : > { %1100 = vmatpush.bf16.msk.msra.mxu3 %vm1099_vm2, %v1389_v20  ;;  %vm1053_vm6 = vmpackc.low %vm377_vm14, %vm375_vm1  ;;  %vm405_vm1 = vcmp.eq.s32.totalorder %v351_v43, %v1550_v14 }
  0x5a   : > { %1054 = vmatpush.bf16.msk.msra.mxu0 %vm1053_vm6, %v1389_v20  ;;  %vm1069_vm9 = vmpackc.low %vm409_vm4, %vm407_vm3  ;;  %vm372_vm3 = vcmp.eq.s32.totalorder %v1542_v6, %v1552_v15  ;;  %vm374_vm4 = vcmp.eq.s32.totalorder %v335_v41, %v1552_v15 }
  0x5b   : > { %1070 = vmatpush.bf16.msk.msra.mxu1 %vm1069_vm9, %v1389_v20  ;;  %vm1085_vm13 = vmpackc.low %vm378_vm5, %vm376_vm7  ;;  %vm404_vm7 = vcmp.eq.s32.totalorder %v350_v42, %v1552_v15  ;;  %vm406_vm5 = vcmp.eq.s32.totalorder %v351_v43, %v1552_v15  ;;  %vm705_vm9 = vcmp.eq.s32.totalorder %v703_v61, 1 }
  0x5c   : > { %1086 = vmatpush.bf16.msk.msra.mxu2 %vm1085_vm13, %v1389_v20  ;;  %vm1101_vm14 = vmpackc.low %vm410_vm8, %vm408_vm10  ;;  %v706_v11 = vsel %vm705_vm9, 1, %v1390_v10  ;;  %vm704_vm13 = vcmp.eq.s32.totalorder %v703_v61, 0 }
  0x5d   : > { %1102 = vmatpush.bf16.msk.msra.mxu3 %vm1101_vm14, %v1389_v20  ;;  %vm1055_vm2 = vmpackc.low %vm373_vm15, %vm371_vm12  ;;  %vm688_vm12 = vcmask 1046528   ;;  %v726_v28 = vsel %vm704_vm13, 1, %v1390_v10  ;;  %v708_v36 = vperm.slane %v706_v11, 1 }
  0x5e   : > { %1056 = vmatpush.bf16.msk.msra.mxu0 %vm1055_vm2, %v1389_v20  ;;  %vm1071_vm6 = vmpackc.low %vm405_vm1, %vm403_vm11  ;;  %vm715_vm11 = vcmask 1044480   ;;  %v727_v40 = vperm.slane %v726_v28, 0  ;;  %v728_v46 = vperm.slane %v726_v28, 1 }
  0x5f   : > { %1072 = vmatpush.bf16.msk.msra.mxu1 %vm1071_vm6, %v1389_v20  ;;  %vm1087_vm10 = vmpackc.low %vm374_vm4, %vm372_vm3  ;;  %vm710_vm3 = vcmp.eq.s32.totalorder %v708_v36, 1  ;;  %vm749_vm6 = vcmask 1043456  }
  0x60   : > { %1088 = vmatpush.bf16.msk.msra.mxu2 %vm1087_vm10, %v1389_v20  ;;  %vm1103_vm8 = vmpackc.low %vm406_vm5, %vm404_vm7  ;;  %vm1728_vm4 = vcmp.eq.s32.totalorder %v727_v40, 1  ;;  %vm730_vm2 = vcmp.eq.s32.totalorder %v728_v46, 1  ;;  %vm766_vm10 = vcmp.lt.s32.totalorder %v333_v2, 256 }
  0x61   : > { %1104 = vmatpush.bf16.msk.msra.mxu3 %vm1103_vm8, %v1389_v20  ;;  %620 = vmatmul.bf16.vlgmr.msra.gmra.mxu0 %v1036_v48  ;;  %v707_v20 = vperm.slane %v706_v11, 0 }
  0x62   : > { %638 = vmatmul.bf16.vlgmr.msra.gmra.mxu1 %v1040_v49 }
  0x63   : > { %656 = vmatmul.bf16.vlgmr.msra.gmra.mxu2 %v1036_v48  ;;  %vm1712_vm1 = vcmp.eq.s32.totalorder %v707_v20, 1 }
  0x64   : > { %674 = vmatmul.bf16.vlgmr.msra.gmra.mxu3 %v1040_v49  ;;  %v741_v49 = vperm.slane %v739_v44, 1 }
  0x66   : > { %vm743_vm7 = vcmp.eq.s32.totalorder %v741_v49, 1 }
  0x71   : > { %625 = vmatmul.bf16.gmra.mxu0 %v606_v53 }
  0x72   : > { %643 = vmatmul.bf16.gmra.mxu1 %v607_v54 }
  0x73   : > { %661 = vmatmul.bf16.gmra.mxu2 %v606_v53 }
  0x74   : > { %679 = vmatmul.bf16.gmra.mxu3 %v607_v54  ;;  %v740_v54 = vperm.slane %v739_v44, 0 }
  0x76   : > { %vm742_vm5 = vcmp.eq.s32.totalorder %v740_v54, 1 }
  0xde   : > { %v621_v55 = vpop.f32.mrf.mxu0 }
  0xdf   : > { %v639_v56 = vpop.f32.mrf.mxu1 }
  0xe0   : > { %v640_v9 = vadd.f32 %v639_v56, %v621_v55 }
  0xe6   : > { %v657_v57 = vpop.f32.mrf.mxu2  ;;  %v623_v58 = vpop.f32.mrf.mxu0 }
  0xe7   : > { %v675_v59 = vpop.f32.mrf.mxu3  ;;  %v641_v60 = vpop.f32.mrf.mxu1 }
  0xe8   : > { %v642_v62 = vadd.f32 %v641_v60, %v623_v58  ;;  %v676_v33 = vadd.f32 %v675_v59, %v657_v57 }
  0xea   : > { %v689_v6 = vrot.slane %v642_v62, 1 }
  0xee   : > { %v659_v63 = vpop.f32.mrf.mxu2  ;;  %v626_v1 = vpop.f32.mrf.mxu0 }
  0xef   : > { %v677_v3 = vpop.f32.mrf.mxu3  ;;  %v644_v4 = vpop.f32.mrf.mxu1 }
  0xf0   : > { %v645_v5 = vadd.f32 %v644_v4, %v626_v1  ;;  %v678_v17 = vadd.f32 %v677_v3, %v659_v63 }
  0xf2   : > { %v690_v7 = vrot.slane %v645_v5, 1  ;;  %v753_v8 = vadd.f32 0.5, %v645_v5  ;;  %v692_v29 = vrot.slane %v678_v17, 1 }
  0xf4   : > { %v691_v12 = vsel %vm688_vm12, %v689_v6, %v690_v7  ;;  %v701_v13 = vadd.f32 %v690_v7, %v642_v62  ;;  %vm1112_vm15 = vcmp.lt.s32.totalorder %v753_v8, 0  ;;  %v1113_v14 = vceil.f32 %v753_v8 }
  0xf5   : > { %v1709_v15 = vadd.f32 %v691_v12, %v640_v9  ;;  %v1114_v16 = vfloor.f32 %v753_v8 }
  0xf6   : > { %v662_v18 = vpop.f32.mrf.mxu2  ;;  %v628_v19 = vpop.f32.mrf.mxu0  ;;  %v717_v22 = vrot.slane %v701_v13, 3 }
  0xf7   : > { %v716_v21 = vrot.slane %v1709_v15, 3  ;;  %v1115_v23 = vsel %vm1112_vm15, %v1113_v14, %v1114_v16  ;;  %v680_v24 = vpop.f32.mrf.mxu3  ;;  %v646_v25 = vpop.f32.mrf.mxu1 }
  0xf8   : > { %v1116_v26 = vcvt.f32.s32 %v1115_v23  ;;  %v681_v27 = vadd.f32 %v680_v24, %v662_v18 }
  0xf9   : > { %v718_v35 = vsel %vm715_vm11, %v716_v21, %v717_v22 }
  0xfa   : > { %v757_v30 = vadd.s32 2, %v1116_v26  ;;  %v693_v31 = vrot.slane %v681_v27, 1  ;;  %v754_v32 = vadd.f32 0.5, %v681_v27  ;;  %v724_v43 = vsel %vm1712_vm1, %v1709_v15, %v718_v35 }
  0xfb   : > { %v733_v53 = vrot.slane %v724_v43, 3 }
  0xfc   : > { %759 = vst [vmem:[#allocation1] sm:$0xff] %v757_v30  ;;  %v694_v37 = vsel %vm688_vm12, %v692_v29, %v693_v31  ;;  %v702_v38 = vadd.f32 %v693_v31, %v678_v17  ;;  %vm1117_vm14 = vcmp.lt.s32.totalorder %v754_v32, 0  ;;  %v1118_v39 = vceil.f32 %v754_v32 }
  0xfd   : > { %v700_v41 = vadd.f32 %v694_v37, %v676_v33  ;;  %v1119_v42 = vfloor.f32 %v754_v32  ;;  %v737_v60 = vsel %vm1728_vm4, %v1709_v15, %v733_v53 }
  0xfe   : > { %v720_v45 = vrot.slane %v702_v38, 3  ;;  %v664_v47 = vpop.f32.mrf.mxu2  ;;  %v744_v1 = vsel %vm742_vm5, 0.0, %v737_v60 }
  0xff   : > { %v719_v48 = vrot.slane %v700_v41, 3  ;;  %v1120_v50 = vsel %vm1117_vm14, %v1118_v39, %v1119_v42  ;;  %v682_v51 = vpop.f32.mrf.mxu3 }
 0x100   : > { %v1121_v52 = vcvt.f32.s32 %v1120_v50 }
 0x101   : > { %v721_v55 = vsel %vm715_vm11, %v719_v48, %v720_v45 }
 0x102   : > { %v725_v57 = vsel %vm710_vm3, %v700_v41, %v721_v55  ;;  %v758_v58 = vadd.s32 2, %v1121_v52 }
 0x103   : > { %v734_v59 = vrot.slane %v725_v57, 3 }
 0x104   : > { %760 = vst [vmem:[#allocation1 + $0x9] sm:$0xff] %v758_v58 }
 0x105   : > { %v738_v61 = vsel %vm730_vm2, %v700_v41, %v734_v59 }
 0x106   : > { %v745_v62 = vsel %vm743_vm7, 0.0, %v738_v61 }
 0x107   : > { %v748_v63 = vrot.slane %v745_v62, 4 }
 0x109   : > { %v750_v3 = vsel %vm749_vm6, %v744_v1, %v748_v63 }
 0x10a   : > { %752 = vst [vmem:[%s316_s18] sm:$0x77] %v750_v3 }
 0x10b   : > { %v762_v4 = vld [vmem:[#allocation1 + $0x2] ss:$9 sm:$0xff] }
 0x10c   : > { %v763_v5 = vsel %vm320_vm0, 1, %v762_v4 }
 0x10d   : > { %768 = vst.msk [vmem:[%s305_s28] sm:$0x3] %vm766_vm10, %v763_v5 }
 0x10e   : > { %1321 = shalt.err (!%p1318_p0)
}
 0x10f   : > { %1130 = dma.vmem_to_hbm [thread:$0]  (%p1487_p4), %s798_s29, 32, %s800_s30, %s779_s6  }
 0x110 PF: > { %s823_s7 = sand.u32 1, %s1364_s15   ;;  %p1144_p2 = pnand %p957_p6, %p1495_p7 }
 0x111   : > { %s824_s19 = scalar_lea.sflag [#allocation4], %s823_s7 }
 0x112   : > { %p1145_p5 = pneg %p1144_p2 }
 0x114   : > { %1359 = dma.done.wait (%p1145_p5), %s824_s19, 32  }
 0x115   : > { %1361 = vsyncadd (%p1145_p5), %s824_s19, 4294967264  ;;  %s24_s20 = sadd.s32 1, %s1384_s20   ;;  %s1803_s21 = sld [smem:[#allocation13_spill]] }
 0x116   : > { %p21_p8 = scmp.ge.s32.totalorder %s24_s20, 4   ;;  %s1804_s17 = sld [smem:[#allocation16_spill]] }
 0x117   : > { %s1805_s18 = sld [smem:[#allocation14_spill]]  ;;  %s1807_s15 = smov %s1368_s16 }
 0x118   : > { %s1806_s19 = sld [smem:[#allocation15_spill]]  ;;  %23 = sbr.rel (!%p21_p8) target bundleno = 10 (0xa), region = 107 }
 0x11b   : > { %s1808_s16 = smov %s1803_s21 }
 0x11d   :  { %830 = vsyncpa [#allocation3], 1 }
 0x11e   :  { %832 = vsyncpa [#allocation3 + $0x1], 1 }
 0x11f   :  { %833 = vsyncpa [#allocation6], 1 }
 0x120   :  { %835 = vsyncpa [#allocation6 + $0x1], 1 }
 0x121   :  { %836 = vsyncpa [#allocation4], 1 }
 0x122   :  { %838 = vsyncpa [#allocation4 + $0x1], 1 }

</bundles_post_ra>
